<compile_context>
chip_gen: v7x
topology: tpu7x:2x2x1
jax: 0.10.0
libtpu: 0.0.40
codegen_flags: <defaults>
</compile_context>

<pallas_src>
import functools

import jax
import jax.numpy as jnp
import numpy as np
from jax.experimental import pallas as pl
from jax.experimental.pallas import tpu as pltpu

HID = 32     # hidden width of the injected MLP sub-networks
EPS = 0.1    # diagonal shift in the Cholesky factor of M^{-1}
LANE = 128   # TPU lane width


def _round_up(x, m):
    return ((x + m - 1) // m) * m


def _softplus(t):
    # numerically stable softplus (linear branch for large t, like nn.Softplus)
    return jnp.where(t > 20.0, t, jnp.log1p(jnp.exp(jnp.minimum(t, 20.0))))


def _sigmoid(t):
    return 1.0 / (1.0 + jnp.exp(-t))


def symoden_kernel(y_ref, w1allT_ref, b1all_ref, w2mg_ref, b2mg_ref,
                   w2mt_ref, w1hs_ref, hpw_ref, out_ref):
    f32 = jnp.float32
    y = y_ref[...]                      # (6, B): batch on the lane axis
    q     = y[0:3, :]                   # (3, B) = (x, cos q, sin q)
    cos_q = y[1:2, :]
    sin_q = y[2:3, :]
    x_dot = y[3:4, :]
    q_dot = y[4:5, :]
    u     = y[5:6, :]

    # ---- ONE q-contraction feeds all three hidden layers (M, g, H nets) ----
    w1allT = w1allT_ref[...]            # (3H, 3)
    pre = (jnp.dot(w1allT, q, preferred_element_type=f32)
           + b1all_ref[...])            # (3H, B) pre-activations

    # M_net / g_net hiddens: one tanh over a 2H-row slab.
    # (The H_net rows still need the p-terms, so their tanh comes later.)
    h_mg = jnp.tanh(pre[0:2 * HID, :])  # (2H, B)
    hm = h_mg[0:HID, :]                 # (H, B)  M_net hidden

    # ---- merged M/g heads: one block-diagonal (5, 2H) dot -------------------
    head = (jnp.dot(w2mg_ref[...], h_mg, preferred_element_type=f32)
            + b2mg_ref[...])            # (5, B): rows 0:3 = a, rows 3:5 = g
    a = head[0:3, :]
    g = head[3:5, :]

    # softplus / sigmoid once on the stacked (3, B) slab, slice rows.
    sp = _softplus(a)
    sg = _sigmoid(a)
    L00 = sp[0:1, :] + EPS
    L10 = a[1:2, :]
    L11 = sp[2:3, :] + EPS
    s0 = sg[0:1, :]
    s2 = sg[2:3, :]

    # M^{-1}(q) = L @ L^T
    m00 = L00 * L00
    m01 = L00 * L10
    m11 = L10 * L10 + L11 * L11

    # p = (M^{-1})^{-1} @ [x_dot, q_dot]   (closed-form 2x2 inverse)
    det = m00 * m11 - m01 * m01
    inv_det = 1.0 / jnp.maximum(det, 1e-20)
    p0 = (m11 * x_dot - m01 * q_dot) * inv_det
    p1 = (-m01 * x_dot + m00 * q_dot) * inv_det

    # ---- H_net hidden + analytic dH/d(q, p) ---------------------------------
    p_stack = jnp.concatenate([p0, p1], axis=0)                     # (2, B)
    hh = jnp.tanh(pre[2 * HID:3 * HID, :]
                  + jnp.dot(hpw_ref[...], p_stack,
                            preferred_element_type=f32))            # (H, B)
    # H_net output weight is folded into w1hs in the wrapper:
    dH = jnp.dot(w1hs_ref[...], 1.0 - hh * hh,
                 preferred_element_type=f32)                        # (5, B)
    dHdx   = dH[0:1, :]
    dHdcos = dH[1:2, :]
    dHdsin = dH[2:3, :]
    dx = dH[3:4, :]        # dH/dp0
    dq = dH[4:5, :]        # dH/dp1

    # ---- forcing term + generalized momenta derivative ----------------------
    F0 = g[0:1, :] * u
    F1 = g[1:2, :] * u
    dp0 = -dHdx + F0
    dp1 = sin_q * dHdcos - cos_q * dHdsin + F1

    # v = d/dt (x, cos q, sin q)
    v1 = -sin_q * dq
    v2 = cos_q * dq

    # ---- analytic dM^{-1}/dt: JVP through M_net, contracted with v ----------
    v_stack = jnp.concatenate([dx, v1, v2], axis=0)                 # (3, B)
    s = jnp.dot(w1allT[0:HID, :], v_stack,
                preferred_element_type=f32)                         # (H, B)
    r = (1.0 - hm * hm) * s
    da = jnp.dot(w2mt_ref[...], r, preferred_element_type=f32)      # (3, B)
    da0, da1, da2 = da[0:1, :], da[1:2, :], da[2:3, :]

    dm00 = 2.0 * L00 * s0 * da0
    dm01 = L10 * s0 * da0 + L00 * da1
    dm11 = 2.0 * L10 * da1 + 2.0 * L11 * s2 * da2

    ddq0 = m00 * dp0 + m01 * dp1 + dm00 * p0 + dm01 * p1
    ddq1 = m01 * dp0 + m11 * dp1 + dm01 * p0 + dm11 * p1

    # single fused, lane-dense (6, tile) store
    out_ref[...] = jnp.concatenate(
        [dx, v1, v2, ddq0, ddq1, jnp.zeros_like(u)], axis=0)


def _pack_weights(params):
    """Fold/pack the 12 raw MLP params into 7 kernel-layout operands."""
    (w1m, b1m, w2mt, b2m, w1h, b1h, w2ht, b2h, w1g, b1g, w2gt, b2g) = params
    del b2h  # dH/dz is independent of H_net's output bias
    hid = w1m.shape[1]
    f32 = jnp.float32
    # One (3H, 3) weight / (3H, 1) bias for the fused hidden-layer q-dot.
    w1allT = jnp.concatenate([w1m, w1g, w1h[0:3, :]], axis=1).T.astype(f32)
    b1all = jnp.concatenate([b1m, b1g, b1h], axis=1).T.astype(f32)
    # Block-diagonal (5, 2H) head weight: rows 0:3 -> a (M_net), rows 3:5 -> g.
    w2mg = jnp.zeros((5, 2 * hid), f32)
    w2mg = w2mg.at[0:3, 0:hid].set(w2mt)
    w2mg = w2mg.at[3:5, hid:2 * hid].set(w2gt)
    b2mg = jnp.concatenate([b2m, b2g], axis=1).T.astype(f32)         # (5, 1)
    # H_net: fold output weight into the first layer's transpose for dH.
    w1hs = (w1h * w2ht).astype(f32)                                  # (5, H)
    hpw = w1h[3:5, :].T.astype(f32)                                  # (H, 2)
    return (w1allT, b1all, w2mg, b2mg, w2mt.astype(f32), w1hs, hpw)


def _choose_tile(batch, tile_b):
    tile_b = max(LANE, (int(tile_b) // LANE) * LANE)
    bs_lane = _round_up(max(batch, 1), LANE)
    tile = max(LANE, min(tile_b, bs_lane))
    # Give the "parallel" grid axis >= 2 steps when the batch allows, so both
    # v7x TensorCores get work (no-op on single-TC v5e/v6e).
    if bs_lane >= 2 * LANE:
        tile = min(tile, _round_up((bs_lane + 1) // 2, LANE))
    return tile


@functools.partial(jax.jit, static_argnames=("tile_b",))
def symoden_r1_t1_forward_lane_major(t, y_t, params, tile_b=2048):
    """Lane-major entry: y_t is the (6, B) state (batch on lanes) -> (6, B).

    An ODE integrator should keep its state in this layout so the per-call
    transpose/pad HBM round-trips of the (bs, 6) adapter are paid only once.
    """
    del t  # time argument is unused, as in the PyTorch module
    weights = _pack_weights(params)
    B = y_t.shape[1]
    tile = _choose_tile(B, tile_b)
    B_pad = _round_up(B, tile)
    if B_pad != B:
        y_t = jnp.pad(y_t.astype(jnp.float32), ((0, 0), (0, B_pad - B)))
    else:
        y_t = y_t.astype(jnp.float32)

    io_spec = pl.BlockSpec((6, tile), lambda i: (0, i))
    # Weights: full-array blocks, constant index_map -> stay VMEM resident.
    w_specs = [pl.BlockSpec(w.shape, lambda i: (0, 0)) for w in weights]

    out = pl.pallas_call(
        symoden_kernel,
        out_shape=jax.ShapeDtypeStruct((6, B_pad), jnp.float32),
        grid=(B_pad // tile,),
        in_specs=[io_spec] + w_specs,
        out_specs=io_spec,
        compiler_params=pltpu.CompilerParams(
            dimension_semantics=("parallel",)),  # shard batch tiles across TCs
    )(y_t, *weights)
    return out[:, :B]


@functools.partial(jax.jit, static_argnames=("tile_b",))
def symoden_r1_t1_forward(t, y, params, tile_b=2048):
    """PyTorch-parity entry: y (bs, 6) float32 -> dy/dt (bs, 6)."""
    bs = y.shape[0]
    B = _round_up(max(bs, 1), LANE)
    y_t = jnp.zeros((6, B), jnp.float32).at[:, :bs].set(y.astype(jnp.float32).T)
    out_t = symoden_r1_t1_forward_lane_major(t, y_t, params, tile_b=tile_b)
    return out_t[:, :bs].T


def init_params(key, hid=HID):
    ks = jax.random.split(key, 6)

    def w(k, shape, scale=0.5):
        return scale * jax.random.normal(k, shape, jnp.float32)

    # M_net: 3 -> hid -> 3 (Cholesky params)
    w1m = w(ks[0], (3, hid)); b1m = jnp.zeros((1, hid), jnp.float32)
    w2mt = w(ks[1], (3, hid)); b2m = jnp.zeros((1, 3), jnp.float32)
    # H_net: 5 -> hid -> 1
    w1h = w(ks[2], (5, hid)); b1h = jnp.zeros((1, hid), jnp.float32)
    w2ht = w(ks[3], (1, hid)); b2h = jnp.zeros((1, 1), jnp.float32)
    # g_net: 3 -> hid -> 2
    w1g = w(ks[4], (3, hid)); b1g = jnp.zeros((1, hid), jnp.float32)
    w2gt = w(ks[5], (2, hid)); b2g = jnp.zeros((1, 2), jnp.float32)
    return (w1m, b1m, w2mt, b2m, w1h, b1h, w2ht, b2h, w1g, b1g, w2gt, b2g)


# --------- pure-JAX autodiff reference mirroring the PyTorch forward ---------
def _mlp_ref(x, W1, b1, W2T, b2):
    h = jnp.tanh(x @ W1 + b1)
    return h @ W2T.T + b2


def ref_forward(y, params):
    w1m, b1m, w2mt, b2m, w1h, b1h, w2ht, b2h, w1g, b1g, w2gt, b2g = params

    def m_inv_fn(q3):
        a = _mlp_ref(q3[None, :], w1m, b1m, w2mt, b2m)[0]
        L00 = _softplus(a[0]) + EPS
        L10 = a[1]
        L11 = _softplus(a[2]) + EPS
        L = jnp.array([[L00, 0.0], [L10, L11]])
        return L @ L.T

    def H_fn(z):
        return _mlp_ref(z[None, :], w1h, b1h, w2ht, b2h)[0, 0]

    def per_sample(yi):
        cq, sq, u = yi[1], yi[2], yi[5]
        q3 = yi[:3]
        Minv = m_inv_fn(q3)
        p = jnp.linalg.inv(Minv) @ yi[3:5]
        z = jnp.concatenate([q3, p])
        dH = jax.grad(H_fn)(z)
        dHdx, dHdc, dHds, dHdp0, dHdp1 = dH[0], dH[1], dH[2], dH[3], dH[4]
        g = _mlp_ref(q3[None, :], w1g, b1g, w2gt, b2g)[0]
        F = g * u
        dx, dq = dHdp0, dHdp1
        dp = jnp.array([-dHdx, sq * dHdc - cq * dHds]) + F
        v = jnp.array([dx, -sq * dq, cq * dq])
        J = jax.jacrev(m_inv_fn)(q3)          # (2,2,3)
        dMdt = J @ v                          # (2,2)
        ddq = Minv @ dp + dMdt @ p
        return jnp.concatenate([jnp.array([dx, -sq * dq, cq * dq]),
                                ddq, jnp.array([0.0])])

    # Evaluate the reference with full-f32 matmuls so it is the accurate side.
    with jax.default_matmul_precision("float32"):
        return jax.vmap(per_sample)(y)


if __name__ == "__main__":
    key = jax.random.PRNGKey(0)
    kp, ky = jax.random.split(key)
    params = init_params(kp)
    t = jnp.zeros(())

    # bs=8 is the small demo shape; bs=260 exercises lane padding + a 2-step
    # "parallel" grid (both v7x TensorCores active).
    for bs in (8, 260):
        yb = jax.random.normal(jax.random.fold_in(ky, bs), (bs, 6), jnp.float32)
        out = jax.block_until_ready(symoden_r1_t1_forward(t, yb, params))
        assert out.shape == (bs, 6)
        ref = ref_forward(yb, params)
        # f32 / bf16-pass MXU round-off amplified through the M^{-1} inverse
        # and dH gradient chain: worst observed ~6e-3 relative -> 2e-2 budget.
        np.testing.assert_allclose(np.asarray(out), np.asarray(ref),
                                   rtol=2e-2, atol=2e-2)
    print("KERNEL_OK")
</pallas_src>

<mosaic_0001>
module attributes {stable_mosaic.version = 11 : i64} {
  func.func @symoden_kernel(%arg0: i32, %arg1: memref<6x128xf32, #tpu.memory_space<vmem>>, %arg2: memref<96x3xf32, #tpu.memory_space<vmem>>, %arg3: memref<96x1xf32, #tpu.memory_space<vmem>>, %arg4: memref<5x64xf32, #tpu.memory_space<vmem>>, %arg5: memref<5x1xf32, #tpu.memory_space<vmem>>, %arg6: memref<3x32xf32, #tpu.memory_space<vmem>>, %arg7: memref<5x32xf32, #tpu.memory_space<vmem>>, %arg8: memref<32x2xf32, #tpu.memory_space<vmem>>, %arg9: memref<6x128xf32, #tpu.memory_space<vmem>>) attributes {dimension_semantics = [#tpu.dimension_semantics<parallel>], iteration_bounds = array<i64: 1>, scalar_prefetch = 0 : i64, scratch_operands = 0 : i64, tpu.core_type = #tpu.core_type<tc>, window_params = [{transform_indices = @transform_0, window_bounds = array<i64: 6, 128>}, {pipeline_mode = #tpu.pipeline_mode<synchronous>, transform_indices = @transform_1, window_bounds = array<i64: 96, 3>}, {pipeline_mode = #tpu.pipeline_mode<synchronous>, transform_indices = @transform_2, window_bounds = array<i64: 96, 1>}, {pipeline_mode = #tpu.pipeline_mode<synchronous>, transform_indices = @transform_3, window_bounds = array<i64: 5, 64>}, {pipeline_mode = #tpu.pipeline_mode<synchronous>, transform_indices = @transform_4, window_bounds = array<i64: 5, 1>}, {pipeline_mode = #tpu.pipeline_mode<synchronous>, transform_indices = @transform_5, window_bounds = array<i64: 3, 32>}, {pipeline_mode = #tpu.pipeline_mode<synchronous>, transform_indices = @transform_6, window_bounds = array<i64: 5, 32>}, {pipeline_mode = #tpu.pipeline_mode<synchronous>, transform_indices = @transform_7, window_bounds = array<i64: 32, 2>}, {transform_indices = @transform_8, window_bounds = array<i64: 6, 128>}]} {
    %c0 = arith.constant 0 : index
    %c0_0 = arith.constant 0 : index
    %0 = vector.load %arg1[%c0, %c0_0] : memref<6x128xf32, #tpu.memory_space<vmem>>, vector<6x128xf32>
    %1 = vector.extract_strided_slice %0 {offsets = [0, 0], sizes = [3, 128], strides = [1, 1]} : vector<6x128xf32> to vector<3x128xf32>
    %2 = vector.extract_strided_slice %0 {offsets = [1, 0], sizes = [1, 128], strides = [1, 1]} : vector<6x128xf32> to vector<1x128xf32>
    %3 = vector.extract_strided_slice %0 {offsets = [2, 0], sizes = [1, 128], strides = [1, 1]} : vector<6x128xf32> to vector<1x128xf32>
    %4 = vector.extract_strided_slice %0 {offsets = [3, 0], sizes = [1, 128], strides = [1, 1]} : vector<6x128xf32> to vector<1x128xf32>
    %5 = vector.extract_strided_slice %0 {offsets = [4, 0], sizes = [1, 128], strides = [1, 1]} : vector<6x128xf32> to vector<1x128xf32>
    %6 = vector.extract_strided_slice %0 {offsets = [5, 0], sizes = [1, 128], strides = [1, 1]} : vector<6x128xf32> to vector<1x128xf32>
    %c0_1 = arith.constant 0 : index
    %c0_2 = arith.constant 0 : index
    %7 = vector.load %arg2[%c0_1, %c0_2] : memref<96x3xf32, #tpu.memory_space<vmem>>, vector<96x3xf32>
    %cst = arith.constant dense<0.000000e+00> : vector<96x128xf32>
    %8 = tpu.matmul %7, %1, %cst {dimension_numbers = #tpu.dot_dimension_numbers<[1], [0], [0], [1], [0, 0, 1, 1], [], []>} : vector<96x3xf32>, vector<3x128xf32>, vector<96x128xf32> -> vector<96x128xf32>
    %c0_3 = arith.constant 0 : index
    %c0_4 = arith.constant 0 : index
    %9 = vector.load %arg3[%c0_3, %c0_4] : memref<96x1xf32, #tpu.memory_space<vmem>>, vector<96x1xf32>
    %10 = vector.broadcast %9 : vector<96x1xf32> to vector<96x128xf32>
    %11 = arith.addf %8, %10 : vector<96x128xf32>
    %12 = vector.extract_strided_slice %11 {offsets = [0, 0], sizes = [64, 128], strides = [1, 1]} : vector<96x128xf32> to vector<64x128xf32>
    %13 = math.tanh %12 : vector<64x128xf32>
    %14 = vector.extract_strided_slice %13 {offsets = [0, 0], sizes = [32, 128], strides = [1, 1]} : vector<64x128xf32> to vector<32x128xf32>
    %c0_5 = arith.constant 0 : index
    %c0_6 = arith.constant 0 : index
    %15 = vector.load %arg4[%c0_5, %c0_6] : memref<5x64xf32, #tpu.memory_space<vmem>>, vector<5x64xf32>
    %cst_7 = arith.constant dense<0.000000e+00> : vector<5x128xf32>
    %16 = tpu.matmul %15, %13, %cst_7 {dimension_numbers = #tpu.dot_dimension_numbers<[1], [0], [0], [1], [0, 0, 1, 1], [], []>} : vector<5x64xf32>, vector<64x128xf32>, vector<5x128xf32> -> vector<5x128xf32>
    %c0_8 = arith.constant 0 : index
    %c0_9 = arith.constant 0 : index
    %17 = vector.load %arg5[%c0_8, %c0_9] : memref<5x1xf32, #tpu.memory_space<vmem>>, vector<5x1xf32>
    %18 = vector.broadcast %17 : vector<5x1xf32> to vector<5x128xf32>
    %19 = arith.addf %16, %18 : vector<5x128xf32>
    %20 = vector.extract_strided_slice %19 {offsets = [0, 0], sizes = [3, 128], strides = [1, 1]} : vector<5x128xf32> to vector<3x128xf32>
    %21 = vector.extract_strided_slice %19 {offsets = [3, 0], sizes = [2, 128], strides = [1, 1]} : vector<5x128xf32> to vector<2x128xf32>
    %cst_10 = arith.constant 2.000000e+01 : f32
    %22 = vector.broadcast %cst_10 : f32 to vector<3x128xf32>
    %23 = arith.cmpf ogt, %20, %22 : vector<3x128xf32>
    %cst_11 = arith.constant 2.000000e+01 : f32
    %24 = vector.broadcast %cst_11 : f32 to vector<3x128xf32>
    %25 = arith.minimumf %20, %24 : vector<3x128xf32>
    %26 = math.exp %25 : vector<3x128xf32>
    %27 = math.log1p %26 : vector<3x128xf32>
    %28 = arith.select %23, %20, %27 : vector<3x128xi1>, vector<3x128xf32>
    %cst_12 = arith.constant 0.000000e+00 : f32
    %29 = vector.broadcast %cst_12 : f32 to vector<3x128xf32>
    %30 = arith.subf %29, %20 : vector<3x128xf32>
    %31 = math.exp %30 : vector<3x128xf32>
    %cst_13 = arith.constant 1.000000e+00 : f32
    %32 = vector.broadcast %cst_13 : f32 to vector<3x128xf32>
    %33 = arith.addf %32, %31 : vector<3x128xf32>
    %cst_14 = arith.constant 1.000000e+00 : f32
    %34 = vector.broadcast %cst_14 : f32 to vector<3x128xf32>
    %35 = arith.divf %34, %33 : vector<3x128xf32>
    %36 = vector.extract_strided_slice %28 {offsets = [0, 0], sizes = [1, 128], strides = [1, 1]} : vector<3x128xf32> to vector<1x128xf32>
    %cst_15 = arith.constant 1.000000e-01 : f32
    %37 = vector.broadcast %cst_15 : f32 to vector<1x128xf32>
    %38 = arith.addf %36, %37 : vector<1x128xf32>
    %39 = vector.extract_strided_slice %20 {offsets = [1, 0], sizes = [1, 128], strides = [1, 1]} : vector<3x128xf32> to vector<1x128xf32>
    %40 = vector.extract_strided_slice %28 {offsets = [2, 0], sizes = [1, 128], strides = [1, 1]} : vector<3x128xf32> to vector<1x128xf32>
    %cst_16 = arith.constant 1.000000e-01 : f32
    %41 = vector.broadcast %cst_16 : f32 to vector<1x128xf32>
    %42 = arith.addf %40, %41 : vector<1x128xf32>
    %43 = vector.extract_strided_slice %35 {offsets = [0, 0], sizes = [1, 128], strides = [1, 1]} : vector<3x128xf32> to vector<1x128xf32>
    %44 = vector.extract_strided_slice %35 {offsets = [2, 0], sizes = [1, 128], strides = [1, 1]} : vector<3x128xf32> to vector<1x128xf32>
    %45 = arith.mulf %38, %38 : vector<1x128xf32>
    %46 = arith.mulf %38, %39 : vector<1x128xf32>
    %47 = arith.mulf %39, %39 : vector<1x128xf32>
    %48 = arith.mulf %42, %42 : vector<1x128xf32>
    %49 = arith.addf %47, %48 : vector<1x128xf32>
    %50 = arith.mulf %45, %49 : vector<1x128xf32>
    %51 = arith.mulf %46, %46 : vector<1x128xf32>
    %52 = arith.subf %50, %51 : vector<1x128xf32>
    %cst_17 = arith.constant 9.99999968E-21 : f32
    %53 = vector.broadcast %cst_17 : f32 to vector<1x128xf32>
    %54 = arith.maximumf %52, %53 : vector<1x128xf32>
    %cst_18 = arith.constant 1.000000e+00 : f32
    %55 = vector.broadcast %cst_18 : f32 to vector<1x128xf32>
    %56 = arith.divf %55, %54 : vector<1x128xf32>
    %57 = arith.mulf %49, %4 : vector<1x128xf32>
    %58 = arith.mulf %46, %5 : vector<1x128xf32>
    %59 = arith.subf %57, %58 : vector<1x128xf32>
    %60 = arith.mulf %59, %56 : vector<1x128xf32>
    %cst_19 = arith.constant 0.000000e+00 : f32
    %61 = vector.broadcast %cst_19 : f32 to vector<1x128xf32>
    %62 = arith.subf %61, %46 : vector<1x128xf32>
    %63 = arith.mulf %62, %4 : vector<1x128xf32>
    %64 = arith.mulf %45, %5 : vector<1x128xf32>
    %65 = arith.addf %63, %64 : vector<1x128xf32>
    %66 = arith.mulf %65, %56 : vector<1x128xf32>
    %67 = tpu.concatenate %60, %66 in 0 : vector<1x128xf32>, vector<1x128xf32> -> vector<2x128xf32>
    %68 = vector.extract_strided_slice %11 {offsets = [64, 0], sizes = [32, 128], strides = [1, 1]} : vector<96x128xf32> to vector<32x128xf32>
    %c0_20 = arith.constant 0 : index
    %c0_21 = arith.constant 0 : index
    %69 = vector.load %arg8[%c0_20, %c0_21] : memref<32x2xf32, #tpu.memory_space<vmem>>, vector<32x2xf32>
    %cst_22 = arith.constant dense<0.000000e+00> : vector<32x128xf32>
    %70 = tpu.matmul %69, %67, %cst_22 {dimension_numbers = #tpu.dot_dimension_numbers<[1], [0], [0], [1], [0, 0, 1, 1], [], []>} : vector<32x2xf32>, vector<2x128xf32>, vector<32x128xf32> -> vector<32x128xf32>
    %71 = arith.addf %68, %70 : vector<32x128xf32>
    %72 = math.tanh %71 : vector<32x128xf32>
    %c0_23 = arith.constant 0 : index
    %c0_24 = arith.constant 0 : index
    %73 = vector.load %arg7[%c0_23, %c0_24] : memref<5x32xf32, #tpu.memory_space<vmem>>, vector<5x32xf32>
    %74 = arith.mulf %72, %72 : vector<32x128xf32>
    %cst_25 = arith.constant 1.000000e+00 : f32
    %75 = vector.broadcast %cst_25 : f32 to vector<32x128xf32>
    %76 = arith.subf %75, %74 : vector<32x128xf32>
    %cst_26 = arith.constant dense<0.000000e+00> : vector<5x128xf32>
    %77 = tpu.matmul %73, %76, %cst_26 {dimension_numbers = #tpu.dot_dimension_numbers<[1], [0], [0], [1], [0, 0, 1, 1], [], []>} : vector<5x32xf32>, vector<32x128xf32>, vector<5x128xf32> -> vector<5x128xf32>
    %78 = vector.extract_strided_slice %77 {offsets = [0, 0], sizes = [1, 128], strides = [1, 1]} : vector<5x128xf32> to vector<1x128xf32>
    %79 = vector.extract_strided_slice %77 {offsets = [1, 0], sizes = [1, 128], strides = [1, 1]} : vector<5x128xf32> to vector<1x128xf32>
    %80 = vector.extract_strided_slice %77 {offsets = [2, 0], sizes = [1, 128], strides = [1, 1]} : vector<5x128xf32> to vector<1x128xf32>
    %81 = vector.extract_strided_slice %77 {offsets = [3, 0], sizes = [1, 128], strides = [1, 1]} : vector<5x128xf32> to vector<1x128xf32>
    %82 = vector.extract_strided_slice %77 {offsets = [4, 0], sizes = [1, 128], strides = [1, 1]} : vector<5x128xf32> to vector<1x128xf32>
    %83 = vector.extract_strided_slice %21 {offsets = [0, 0], sizes = [1, 128], strides = [1, 1]} : vector<2x128xf32> to vector<1x128xf32>
    %84 = arith.mulf %83, %6 : vector<1x128xf32>
    %85 = vector.extract_strided_slice %21 {offsets = [1, 0], sizes = [1, 128], strides = [1, 1]} : vector<2x128xf32> to vector<1x128xf32>
    %86 = arith.mulf %85, %6 : vector<1x128xf32>
    %cst_27 = arith.constant 0.000000e+00 : f32
    %87 = vector.broadcast %cst_27 : f32 to vector<1x128xf32>
    %88 = arith.subf %87, %78 : vector<1x128xf32>
    %89 = arith.addf %88, %84 : vector<1x128xf32>
    %90 = arith.mulf %3, %79 : vector<1x128xf32>
    %91 = arith.mulf %2, %80 : vector<1x128xf32>
    %92 = arith.subf %90, %91 : vector<1x128xf32>
    %93 = arith.addf %92, %86 : vector<1x128xf32>
    %cst_28 = arith.constant 0.000000e+00 : f32
    %94 = vector.broadcast %cst_28 : f32 to vector<1x128xf32>
    %95 = arith.subf %94, %3 : vector<1x128xf32>
    %96 = arith.mulf %95, %82 : vector<1x128xf32>
    %97 = arith.mulf %2, %82 : vector<1x128xf32>
    %98 = tpu.concatenate %81, %96, %97 in 0 : vector<1x128xf32>, vector<1x128xf32>, vector<1x128xf32> -> vector<3x128xf32>
    %99 = vector.extract_strided_slice %7 {offsets = [0, 0], sizes = [32, 3], strides = [1, 1]} : vector<96x3xf32> to vector<32x3xf32>
    %cst_29 = arith.constant dense<0.000000e+00> : vector<32x128xf32>
    %100 = tpu.matmul %99, %98, %cst_29 {dimension_numbers = #tpu.dot_dimension_numbers<[1], [0], [0], [1], [0, 0, 1, 1], [], []>} : vector<32x3xf32>, vector<3x128xf32>, vector<32x128xf32> -> vector<32x128xf32>
    %101 = arith.mulf %14, %14 : vector<32x128xf32>
    %cst_30 = arith.constant 1.000000e+00 : f32
    %102 = vector.broadcast %cst_30 : f32 to vector<32x128xf32>
    %103 = arith.subf %102, %101 : vector<32x128xf32>
    %104 = arith.mulf %103, %100 : vector<32x128xf32>
    %c0_31 = arith.constant 0 : index
    %c0_32 = arith.constant 0 : index
    %105 = vector.load %arg6[%c0_31, %c0_32] : memref<3x32xf32, #tpu.memory_space<vmem>>, vector<3x32xf32>
    %cst_33 = arith.constant dense<0.000000e+00> : vector<3x128xf32>
    %106 = tpu.matmul %105, %104, %cst_33 {dimension_numbers = #tpu.dot_dimension_numbers<[1], [0], [0], [1], [0, 0, 1, 1], [], []>} : vector<3x32xf32>, vector<32x128xf32>, vector<3x128xf32> -> vector<3x128xf32>
    %107 = vector.extract_strided_slice %106 {offsets = [0, 0], sizes = [1, 128], strides = [1, 1]} : vector<3x128xf32> to vector<1x128xf32>
    %108 = vector.extract_strided_slice %106 {offsets = [1, 0], sizes = [1, 128], strides = [1, 1]} : vector<3x128xf32> to vector<1x128xf32>
    %109 = vector.extract_strided_slice %106 {offsets = [2, 0], sizes = [1, 128], strides = [1, 1]} : vector<3x128xf32> to vector<1x128xf32>
    %cst_34 = arith.constant 2.000000e+00 : f32
    %110 = vector.broadcast %cst_34 : f32 to vector<1x128xf32>
    %111 = arith.mulf %110, %38 : vector<1x128xf32>
    %112 = arith.mulf %111, %43 : vector<1x128xf32>
    %113 = arith.mulf %112, %107 : vector<1x128xf32>
    %114 = arith.mulf %39, %43 : vector<1x128xf32>
    %115 = arith.mulf %114, %107 : vector<1x128xf32>
    %116 = arith.mulf %38, %108 : vector<1x128xf32>
    %117 = arith.addf %115, %116 : vector<1x128xf32>
    %cst_35 = arith.constant 2.000000e+00 : f32
    %118 = vector.broadcast %cst_35 : f32 to vector<1x128xf32>
    %119 = arith.mulf %118, %39 : vector<1x128xf32>
    %120 = arith.mulf %119, %108 : vector<1x128xf32>
    %cst_36 = arith.constant 2.000000e+00 : f32
    %121 = vector.broadcast %cst_36 : f32 to vector<1x128xf32>
    %122 = arith.mulf %121, %42 : vector<1x128xf32>
    %123 = arith.mulf %122, %44 : vector<1x128xf32>
    %124 = arith.mulf %123, %109 : vector<1x128xf32>
    %125 = arith.addf %120, %124 : vector<1x128xf32>
    %126 = arith.mulf %45, %89 : vector<1x128xf32>
    %127 = arith.mulf %46, %93 : vector<1x128xf32>
    %128 = arith.addf %126, %127 : vector<1x128xf32>
    %129 = arith.mulf %113, %60 : vector<1x128xf32>
    %130 = arith.addf %128, %129 : vector<1x128xf32>
    %131 = arith.mulf %117, %66 : vector<1x128xf32>
    %132 = arith.addf %130, %131 : vector<1x128xf32>
    %133 = arith.mulf %46, %89 : vector<1x128xf32>
    %134 = arith.mulf %49, %93 : vector<1x128xf32>
    %135 = arith.addf %133, %134 : vector<1x128xf32>
    %136 = arith.mulf %117, %60 : vector<1x128xf32>
    %137 = arith.addf %135, %136 : vector<1x128xf32>
    %138 = arith.mulf %125, %66 : vector<1x128xf32>
    %139 = arith.addf %137, %138 : vector<1x128xf32>
    %cst_37 = arith.constant 0.000000e+00 : f32
    %140 = vector.broadcast %cst_37 : f32 to vector<1x128xf32>
    %141 = tpu.concatenate %81, %96, %97, %132, %139, %140 in 0 : vector<1x128xf32>, vector<1x128xf32>, vector<1x128xf32>, vector<1x128xf32>, vector<1x128xf32>, vector<1x128xf32> -> vector<6x128xf32>
    %c0_38 = arith.constant 0 : index
    %c0_39 = arith.constant 0 : index
    %142 = vector.load %arg9[%c0_38, %c0_39] : memref<6x128xf32, #tpu.memory_space<vmem>>, vector<6x128xf32>
    tpu.vector_store %arg9[%c0_38, %c0_39], %141 {strides = array<i32>} : memref<6x128xf32, #tpu.memory_space<vmem>>, vector<6x128xf32>,
    return
  }
  func.func @transform_0(%arg0: i32) -> (i32, i32) {
    %c0_i32 = arith.constant 0 : i32
    %c0_i32_0 = arith.constant 0 : i32
    return %c0_i32, %arg0 : i32, i32
  }
  func.func @transform_1(%arg0: i32) -> (i32, i32) {
    %c0_i32 = arith.constant 0 : i32
    %c0_i32_0 = arith.constant 0 : i32
    %c0_i32_1 = arith.constant 0 : i32
    return %c0_i32, %c0_i32_0 : i32, i32
  }
  func.func @transform_2(%arg0: i32) -> (i32, i32) {
    %c0_i32 = arith.constant 0 : i32
    %c0_i32_0 = arith.constant 0 : i32
    %c0_i32_1 = arith.constant 0 : i32
    return %c0_i32, %c0_i32_0 : i32, i32
  }
  func.func @transform_3(%arg0: i32) -> (i32, i32) {
    %c0_i32 = arith.constant 0 : i32
    %c0_i32_0 = arith.constant 0 : i32
    %c0_i32_1 = arith.constant 0 : i32
    return %c0_i32, %c0_i32_0 : i32, i32
  }
  func.func @transform_4(%arg0: i32) -> (i32, i32) {
    %c0_i32 = arith.constant 0 : i32
    %c0_i32_0 = arith.constant 0 : i32
    %c0_i32_1 = arith.constant 0 : i32
    return %c0_i32, %c0_i32_0 : i32, i32
  }
  func.func @transform_5(%arg0: i32) -> (i32, i32) {
    %c0_i32 = arith.constant 0 : i32
    %c0_i32_0 = arith.constant 0 : i32
    %c0_i32_1 = arith.constant 0 : i32
    return %c0_i32, %c0_i32_0 : i32, i32
  }
  func.func @transform_6(%arg0: i32) -> (i32, i32) {
    %c0_i32 = arith.constant 0 : i32
    %c0_i32_0 = arith.constant 0 : i32
    %c0_i32_1 = arith.constant 0 : i32
    return %c0_i32, %c0_i32_0 : i32, i32
  }
  func.func @transform_7(%arg0: i32) -> (i32, i32) {
    %c0_i32 = arith.constant 0 : i32
    %c0_i32_0 = arith.constant 0 : i32
    %c0_i32_1 = arith.constant 0 : i32
    return %c0_i32, %c0_i32_0 : i32, i32
  }
  func.func @transform_8(%arg0: i32) -> (i32, i32) {
    %c0_i32 = arith.constant 0 : i32
    %c0_i32_0 = arith.constant 0 : i32
    return %c0_i32, %arg0 : i32, i32
  }
}

</mosaic_0001>

<bundles_post_ra>
// kernel: symoden_r1_t1_forward_lane_major.1
= control target key start
LH: loop header
LB: loop body
LE: loop exit
PB: predicated region body
PF: predicated region fallthrough
CT: control target
= control target key end

     0   :  { %vm152_vm0 = vcmask 1042432   ;;  %vm115_vm1 = vcmask 23552   ;;  %v1172_v4 = vmov 0   ;;  %s1487_s0 = inlined_call_operand.vmem [shape: f32[6,128], index: 0, kind: input, shape index: {}]   ;;  %s1488_s1 = inlined_call_operand.vmem [shape: f32[96,3], index: 1, kind: input, shape index: {}]   ;;  %s1489_s2 = inlined_call_operand.vmem [shape: f32[96,1], index: 2, kind: input, shape index: {}]   ;;  %s1490_s3 = inlined_call_operand.vmem [shape: f32[5,64], index: 3, kind: input, shape index: {}]   ;;  %s1491_s4 = inlined_call_operand.vmem [shape: f32[5,1], index: 4, kind: input, shape index: {}]   ;;  %s1492_s5 = inlined_call_operand.vmem [shape: f32[3,32], index: 5, kind: input, shape index: {}]   ;;  %s1493_s6 = inlined_call_operand.vmem [shape: f32[5,32], index: 6, kind: input, shape index: {}]   ;;  %s1494_s7 = inlined_call_operand.vmem [shape: f32[32,2], index: 7, kind: input, shape index: {}]   ;;  %s1495_s8 = inlined_call_operand.hbm [shape: f32[6,128], index: 8, kind: output, shape index: {}]  }
   0x1   :  { %v1225_v0 = vld [vmem:[%s1487_s0] sm:$0x3f]  ;;  %v1235_v2 = vld [vmem:[%s1488_s1 + $0x8] sm:$0xff]  ;;  %v1244_v3 = vld [vmem:[%s1488_s1 + $0x10] sm:$0xff]  ;;  %1112 = vset.pattern.permute.xlu0 %v1172_v4  ;;  %1113 = vset.pattern.permute.xlu1 %v1172_v4 }
   0x2   :  { %v1230_v1 = vld [vmem:[%s1488_s1] sm:$0xff]  ;;  %998 = vmatprep.subr.msk.mxu0 %vm152_vm0, %v1225_v0  ;;  %v45_v6 = vld [vmem:[%s1489_s2 + $0x10] sm:$0xff]  ;;  %v1261_v7 = vld [vmem:[%s1488_s1 + $0x18] sm:$0xff] }
   0x3   :  { %1000 = vmatprep.mubr.msk.f32.mxu0 %vm115_vm1, %v1230_v1  ;;  %999 = vmatpush3.msk.msra.mxu0 %vm152_vm0, %v1225_v0  ;;  %v43_v5 = vld [vmem:[%s1489_s2] sm:$0xff]  ;;  %v44_v9 = vld [vmem:[%s1489_s2 + $0x8] sm:$0xff]  ;;  %v46_v10 = vld [vmem:[%s1489_s2 + $0x18] sm:$0xff] }
   0x4   :  { %1001 = vmatmul.mubr.msk.f32.vlgmr.msra.gmra.mrb[0].mxu0 %vm115_vm1, %v1235_v2  ;;  %57 = vperm.xlu0 %1112, %v43_v5   ;;  %v35_v8 = vld [vmem:[%s1488_s1 + $0x20] sm:$0xff] }
   0x5   :  { %1003 = vmatprep.mubr.msk.f32.mxu0 %vm115_vm1, %v1244_v3  ;;  %67 = vperm.xlu1 %1113, %v45_v6  }
   0x8   :  { %1004 = vmatmul.mubr.msk.f32.gmra.mrb[2].mxu0 %vm115_vm1, %v1261_v7 }
   0x9   :  { %13 = vsyncpa [#allocation3], 0  ;;  %1006 = vmatprep.mubr.msk.f32.mxu0 %vm115_vm1, %v35_v8  ;;  %v36_v11 = vld [vmem:[%s1488_s1 + $0x28] sm:$0xff]  ;;  %62 = vperm.xlu0 %1112, %v44_v9   ;;  %v37_v12 = vld [vmem:[%s1488_s1 + $0x30] sm:$0xff]  ;;  %v1173_v23 = vmov 0.0|0.0   ;;  %vm1174_vm2 = vmmov 0  }
   0xa   :  { %v47_v13 = vld [vmem:[%s1489_s2 + $0x20] sm:$0xff]  ;;  %72 = vperm.xlu1 %1113, %v46_v10   ;;  %v48_v14 = vld [vmem:[%s1489_s2 + $0x28] sm:$0xff]  ;;  %v38_v15 = vld [vmem:[%s1488_s1 + $0x38] sm:$0xff]  ;;  %1075 = vmatprep.subr.bf16.mxu1 %v1173_v23  ;;  %v1175_v24 = vmov 0.0   ;;  %vm296_vm3 = vcmask 523264   ;;  %vm443_vm4 = vcmask 15360  }
   0xb   :  { %v49_v16 = vld [vmem:[%s1489_s2 + $0x30] sm:$0xff]  ;;  %v50_v17 = vld [vmem:[%s1489_s2 + $0x38] sm:$0xff]  ;;  %v290_v18 = vld [vmem:[%s1491_s4] sm:$0x1f]  ;;  %1034 = vmatprep.mubr.msk.f32.mxu1 %vm1174_vm2, %v1175_v24  ;;  %v410_v10 = vrot.slane %v1225_v0, 2  ;;  %vm437_vm7 = vcmask 1040384  }
   0xc   :  { %1007 = vmatmul.mubr.msk.f32.gmra.mrb[4].mxu0 %vm115_vm1, %v36_v11  ;;  %v51_v19 = vld [vmem:[%s1489_s2 + $0x40] sm:$0xff]  ;;  %v52_v20 = vld [vmem:[%s1489_s2 + $0x48] sm:$0xff]  ;;  %v53_v21 = vld [vmem:[%s1489_s2 + $0x50] sm:$0xff]  ;;  %vm456_vm8 = vcmask 1041408   ;;  %vm562_vm9 = vcmask 261120   ;;  %vm911_vm10 = vcmask 1043456  }
   0xd   :  { %1009 = vmatprep.mubr.msk.f32.mxu0 %vm115_vm1, %v37_v12  ;;  %77 = vperm.xlu0 %1112, %v47_v13   ;;  %v54_v22 = vld [vmem:[%s1489_s2 + $0x58] sm:$0xff]  ;;  %v289_v61 = vld [vmem:[%s1490_s3] sm:$0x1f]  ;;  %v40_v63 = vld [vmem:[%s1488_s1 + $0x48] sm:$0xff]  ;;  %vm913_vm11 = vcmask 1044480  }
   0xe   :  { %82 = vperm.xlu1 %1113, %v48_v14   ;;  %v39_v62 = vld [vmem:[%s1488_s1 + $0x40] sm:$0xff]  ;;  %v41_v4 = vld [vmem:[%s1488_s1 + $0x50] sm:$0xff]  ;;  %v42_v5 = vld [vmem:[%s1488_s1 + $0x58] sm:$0xff] }
   0xf   :  { %v439_v6 = vld [vmem:[%s1494_s7] sm:$0xff] }
  0x10   :  { %1010 = vmatmul.mubr.msk.f32.gmra.mrb[6].mxu0 %vm115_vm1, %v38_v15 }
  0x11   :  { %87 = vperm.xlu0 %1112, %v49_v16   ;;  %1012 = vmatprep.mubr.msk.f32.mxu0 %vm115_vm1, %v39_v62  ;;  %v441_v62 = vld [vmem:[%s1494_s7 + $0x10] sm:$0xff] }
  0x12   :  { %92 = vperm.xlu1 %1113, %v50_v17  }
  0x14   :  { %1013 = vmatmul.mubr.msk.f32.gmra.mrb[8].mxu0 %vm115_vm1, %v40_v63  ;;  %v442_v63 = vld [vmem:[%s1494_s7 + $0x18] sm:$0xff] }
  0x15   :  { %293 = vperm.xlu0 %1112, %v290_v18   ;;  %1015 = vmatprep.mubr.msk.f32.mxu0 %vm115_vm1, %v41_v4 }
  0x16   :  { %97 = vperm.xlu1 %1113, %v51_v19  }
  0x18   :  { %1016 = vmatmul.mubr.msk.f32.gmra.mrb[10].mxu0 %vm115_vm1, %v42_v5 }
  0x19   :  { %102 = vperm.xlu0 %1112, %v52_v20   ;;  %1039 = vmatprep.mubr.msk.f32.mxu0 %vm443_vm4, %v439_v6 }
  0x1a   :  { %107 = vperm.xlu1 %1113, %v53_v21  }
  0x1d   :  { %112 = vperm.xlu0 %1112, %v54_v22  }
  0x83   :  { %v58_v25 = vpop.permute.xlu0 %57 }
  0x84   :  { %v68_v26 = vpop.permute.xlu1 %67 }
  0x88   :  { %v63_v27 = vpop.permute.xlu0 %62 }
  0x89   :  { %v73_v28 = vpop.permute.xlu1 %72 }
  0x8c   :  { %v78_v38 = vpop.permute.xlu0 %77 }
  0x8d   :  { %v83_v36 = vpop.permute.xlu1 %82 }
  0x90   :  { %v88_v46 = vpop.permute.xlu0 %87 }
  0x91   :  { %v93_v43 = vpop.permute.xlu1 %92 }
  0x94   :  { %v294_v8 = vpop.permute.xlu0 %293 }
  0x95   :  { %v98_v5 = vpop.permute.xlu1 %97 }
  0x98   :  { %v103_v4 = vpop.permute.xlu0 %102 }
  0xd7   :  { %v1002_v29 = vpop.f32.mrb[0].mxu0 }
  0xd8   :  { %v228_v30 = vadd.f32 %v1002_v29, %v63_v27  ;;  %v222_v31 = vpop.f32.mrb[1].mxu0 }
  0xd9   :  { %v223_v32 = vadd.f32 %v222_v31, %v58_v25 }
  0xda   :  { %1114 = vtanh.f32 %v228_v30 }
  0xdb   :  { %1116 = vtanh.f32 %v223_v32  ;;  %v1005_v33 = vpop.f32.mrb[2].mxu0 }
  0xdc   :  { %v238_v34 = vadd.f32 %v1005_v33, %v73_v28  ;;  %v232_v35 = vpop.f32.mrb[3].mxu0 }
  0xdd   :  { %v233_v37 = vadd.f32 %v232_v35, %v68_v26 }
  0xde   :  { %1118 = vtanh.f32 %v238_v34 }
  0xdf   :  { %1120 = vtanh.f32 %v233_v37  ;;  %v1008_v39 = vpop.f32.mrb[4].mxu0 }
  0xe0   :  { %v248_v40 = vadd.f32 %v1008_v39, %v83_v36  ;;  %v242_v41 = vpop.f32.mrb[5].mxu0 }
  0xe1   :  { %v243_v42 = vadd.f32 %v242_v41, %v78_v38 }
  0xe2   :  { %1122 = vtanh.f32 %v248_v40  ;;  %v413_v40 = vrot.slane %v1225_v0, 4 }
  0xe3   :  { %1124 = vtanh.f32 %v243_v42  ;;  %v1011_v44 = vpop.f32.mrb[6].mxu0  ;;  %v425_v42 = vrot.slane %v1225_v0, 3 }
  0xe4   :  { %v1317_v45 = vpop.eup %1114  ;;  %v258_v47 = vadd.f32 %v1011_v44, %v93_v43  ;;  %v252_v48 = vpop.f32.mrb[7].mxu0 }
  0xe5   :  { %v1319_v49 = vpop.eup %1116  ;;  %v253_v50 = vadd.f32 %v252_v48, %v88_v46 }
  0xe6   :  { %1126 = vtanh.f32 %v258_v47  ;;  %v1076_v51 = vpack.c.bf16 %v1317_v45, %v1319_v49 }
  0xe7   :  { %1128 = vtanh.f32 %v253_v50 }
  0xe8   :  { %v1323_v52 = vpop.eup %1118  ;;  %1077 = vmatpush3.bf16.msra.mxu1 %v1076_v51 }
  0xe9   :  { %v1325_v53 = vpop.eup %1120  ;;  %1078 = vmatprep.subr.bf16.mxu1 %v1173_v23 }
  0xea   :  { %v1079_v54 = vpack.c.bf16 %v1323_v52, %v1325_v53 }
  0xec   :  { %v1123_v55 = vpop.eup %1122  ;;  %1080 = vmatpush3.bf16.msra.mxu1 %v1079_v54 }
  0xed   :  { %v1125_v56 = vpop.eup %1124  ;;  %1081 = vmatprep.subr.bf16.mxu1 %v1173_v23 }
  0xee   :  { %v1082_v57 = vpack.c.bf16 %v1123_v55, %v1125_v56 }
  0xf0   :  { %v1127_v58 = vpop.eup %1126  ;;  %1083 = vmatpush3.bf16.msra.mxu1 %v1082_v57 }
  0xf1   :  { %v1129_v59 = vpop.eup %1128  ;;  %1084 = vmatprep.subr.bf16.mxu1 %v1173_v23 }
  0xf2   :  { %v1085_v60 = vpack.c.bf16 %v1127_v58, %v1129_v59 }
  0xf4   :  { %1086 = vmatpush3.bf16.msra.mxu1 %v1085_v60 }
  0xf5   :  { %1087 = vmatprep.subr.bf16.mxu1 %v1173_v23 }
  0xf7   :  { %1035 = vmatmul.mubr.msk.f32.vlgmr.msra.gmra.mrb[0].mxu1 %vm296_vm3, %v289_v61  ;;  %v440_v61 = vld [vmem:[%s1494_s7 + $0x8] sm:$0xff] }
  0xf8   :  { %1053 = vmatprep.mubr.msk.f32.mxu1 %vm1174_vm2, %v1175_v24 }
 0x1ca   :  { %v366_v9 = vpop.f32.mrb[0].mxu1 }
 0x1cb   :  { %v1359_v11 = vadd.f32 %v366_v9, %v294_v8  ;;  %v1036_v12 = vpop.f32.mrb[1].mxu1 }
 0x1cc   :  { %v113_v12 = vpop.permute.xlu0 %112 }
 0x1cd   :  { %v371_v13 = vmin.f32 %v1359_v11, 20.0  ;;  %v1363_v14 = vmul.f32 %v410_v10, %v1359_v11  ;;  %vm370_vm6 = vcmp.gt.f32.partialorder %v1359_v11, 20.0  ;;  %v393_v30 = vrot.slane %v1359_v11, 1 }
 0x1ce   :  { %v396_v31 = vmul.f32 %v1359_v11, %v1359_v11 }
 0x1cf   :  { %v372_v15 = vmul.f32 1.442695, %v371_v13 }
 0x1d1   :  { %1130 = vpow2.f32 %v372_v15  ;;  %v108_v15 = vpop.permute.xlu1 %107 }
 0x1db   :  { %v1131_v16 = vpop.eup %1130 }
 0x1dc   :  { %v374_v17 = vadd.f32 1.0, %v1131_v16  ;;  %v377_v18 = vmul.f32 -0.5, %v1131_v16  ;;  %v380_v20 = vand.u32 2147483647, %v1131_v16 }
 0x1de   :  { %1132 = vlog2.f32 %v374_v17  ;;  %v378_v19 = vadd.f32 1.0, %v377_v18  ;;  %vm381_vm5 = vcmp.lt.f32.partialorder %v380_v20, 0.0004427343 }
 0x1e0   :  { %v379_v25 = vmul.f32 %v1131_v16, %v378_v19 }
 0x1e8   :  { %v1133_v21 = vpop.eup %1132 }
 0x1e9   :  { %v376_v22 = vmul.f32 0.6931472, %v1133_v21 }
 0x1eb   :  { %v382_v26 = vsel %vm381_vm5, %v379_v25, %v376_v22 }
 0x1ec   :  { %v383_v27 = vsel %vm370_vm6, %v1359_v11, %v382_v26 }
 0x1ed   :  { %v1367_v28 = vadd.f32 0.1, %v383_v27 }
 0x1ef   :  { %v1371_v29 = vmul.f32 %v1367_v28, %v1367_v28  ;;  %v1378_v33 = vmul.f32 %v393_v30, %v1367_v28 }
 0x1f1   :  { %v398_v32 = vrot.slane %v1371_v29, 1  ;;  %v405_v37 = vmul.f32 %v1378_v33, %v1378_v33  ;;  %v424_v41 = vsub.f32 0.0, %v1378_v33  ;;  %v415_v43 = vmul.f32 %v413_v40, %v1378_v33 }
 0x1f2   :  { %v428_v47 = vmul.f32 %v413_v40, %v1371_v29  ;;  %v660_v40 = vsub.f32 0.0, %v1225_v0 }
 0x1f3   :  { %v1380_v34 = vadd.f32 %v398_v32, %v396_v31  ;;  %v427_v44 = vmul.f32 %v425_v42, %v424_v41  ;;  %v417_v48 = vrot.slane %v415_v43, 7  ;;  %v642_v42 = vrot.slane %v1363_v14, 3 }
 0x1f5   :  { %v402_v35 = vrot.slane %v1380_v34, 1  ;;  %v412_v46 = vmul.f32 %v410_v10, %v1380_v34  ;;  %v429_v50 = vadd.f32 %v428_v47, %v427_v44 }
 0x1f7   :  { %v404_v36 = vmul.f32 %v402_v35, %v1371_v29  ;;  %v419_v54 = vsub.f32 %v412_v46, %v417_v48 }
 0x1f9   :  { %v406_v38 = vsub.f32 %v404_v36, %v405_v37 }
 0x1fb   :  { %v407_v39 = vmax.f32 %v406_v38, 1e-20  ;;  %v553_v38 = vld [vmem:[%s1493_s6] sm:$0x1f] }
 0x1fd   :  { %1134 = vrcp.f32 %v407_v39  ;;  %v637_v39 = vrot.slane %v1225_v0, 1 }
 0x207   :  { %v1135_v51 = vpop.eup %1134 }
 0x208   :  { %v421_v55 = vrot.slane %v1135_v51, 7  ;;  %v430_v56 = vmul.f32 %v1135_v51, %v429_v50  ;;  %v639_v51 = vmul.f32 %v637_v39, %v1359_v11 }
 0x20a   :  { %v1392_v57 = vmul.f32 %v421_v55, %v419_v54  ;;  %v1395_v59 = vrot.slane %v430_v56, 7 }
 0x20c   :  { %v432_v58 = vrot.slane %v1392_v57, 1 }
 0x20e   :  { %v438_v60 = vsel %vm437_vm7, %v432_v58, %v1395_v59 }
 0x20f   :  { %1037 = vmatprep.subr.msk.mxu0 %vm456_vm8, %v438_v60 }
 0x210   :  { %1038 = vmatpush3.msk.msra.mxu0 %vm456_vm8, %v438_v60 }
 0x211   :  { %1040 = vmatmul.mubr.msk.f32.vlgmr.msra.gmra.mrb[8].mxu0 %vm443_vm4, %v440_v61  ;;  %1093 = vmatprep.subr.bf16.mxu0 %v1173_v23 }
 0x212   :  { %1042 = vmatprep.mubr.msk.f32.mxu0 %vm443_vm4, %v441_v62 }
 0x215   :  { %1043 = vmatmul.mubr.msk.f32.gmra.mrb[10].mxu0 %vm443_vm4, %v442_v63 }
 0x216   :  { %1072 = vmatprep.mubr.msk.f32.mxu0 %vm1174_vm2, %v1175_v24 }
 0x2e4   :  { %v1041_v6 = vpop.f32.mrb[8].mxu0 }
 0x2e5   :  { %v1099_v8 = vadd.f32 %v1041_v6, %v103_v4  ;;  %v526_v9 = vpop.f32.mrb[9].mxu0  ;;  %v657_v4 = vrot.slane %v639_v51, 2 }
 0x2e6   :  { %v1100_v10 = vadd.f32 %v526_v9, %v98_v5 }
 0x2e7   :  { %1136 = vtanh.f32 %v1099_v8 }
 0x2e8   :  { %1138 = vtanh.f32 %v1100_v10  ;;  %v1044_v13 = vpop.f32.mrb[10].mxu0 }
 0x2e9   :  { %v1101_v16 = vadd.f32 %v1044_v13, %v113_v12  ;;  %v536_v17 = vpop.f32.mrb[11].mxu0 }
 0x2ea   :  { %v1102_v18 = vadd.f32 %v536_v17, %v108_v15 }
 0x2eb   :  { %1140 = vtanh.f32 %v1101_v16 }
 0x2ec   :  { %1142 = vtanh.f32 %v1102_v18 }
 0x2f1   :  { %v1137_v19 = vpop.eup %1136 }
 0x2f2   :  { %v1139_v20 = vpop.eup %1138  ;;  %v555_v21 = vmul.f32 %v1137_v19, %v1137_v19 }
 0x2f3   :  { %v554_v24 = vmul.f32 %v1139_v20, %v1139_v20 }
 0x2f4   :  { %v559_v22 = vsub.f32 1.0, %v555_v21 }
 0x2f5   :  { %v1141_v25 = vpop.eup %1140  ;;  %v558_v26 = vsub.f32 1.0, %v554_v24 }
 0x2f6   :  { %v1143_v27 = vpop.eup %1142  ;;  %v557_v30 = vmul.f32 %v1141_v25, %v1141_v25 }
 0x2f7   :  { %v1088_v31 = vpack.c.bf16 %v559_v22, %v558_v26  ;;  %v556_v32 = vmul.f32 %v1143_v27, %v1143_v27 }
 0x2f8   :  { %v561_v35 = vsub.f32 1.0, %v557_v30 }
 0x2f9   :  { %v560_v36 = vsub.f32 1.0, %v556_v32  ;;  %1089 = vmatpush3.bf16.msra.mxu1 %v1088_v31 }
 0x2fa   :  { %1090 = vmatprep.subr.bf16.mxu1 %v1173_v23 }
 0x2fb   :  { %v1091_v37 = vpack.c.bf16 %v561_v35, %v560_v36 }
 0x2fd   :  { %1092 = vmatpush3.bf16.msra.mxu1 %v1091_v37 }
 0x300   :  { %1054 = vmatmul.mubr.msk.f32.vlgmr.msra.gmra.mrb[2].mxu1 %vm562_vm9, %v553_v38  ;;  %v849_v38 = vmul.f32 2.0, %v1367_v28 }
 0x301   :  { %1058 = vmatprep.mubr.msk.f32.mxu1 %vm115_vm1, %v1230_v1 }
 0x3d3   :  { %v632_v41 = vpop.f32.mrb[2].mxu1 }
 0x3d4   :  { %v640_v43 = vsub.f32 0.0, %v632_v41  ;;  %v646_v44 = vrot.slane %v632_v41, 7  ;;  %v649_v46 = vrot.slane %v632_v41, 1  ;;  %v661_v47 = vrot.slane %v632_v41, 2  ;;  %v1055_v48 = vpop.f32.mrb[3].mxu1 }
 0x3d5   :  { %v664_v50 = vrot.slane %v632_v41, 3 }
 0x3d6   :  { %v644_v54 = vadd.f32 %v642_v42, %v640_v43  ;;  %v651_v55 = vmul.f32 %v649_v46, %v1225_v0  ;;  %v663_v56 = vmul.f32 %v661_v47, %v660_v40  ;;  %v648_v60 = vmul.f32 %v646_v44, %v1225_v0 }
 0x3d7   :  { %v666_v1 = vmul.f32 %v664_v50, %v1225_v0  ;;  %v867_v40 = vmul.f32 2.0, %v1359_v11 }
 0x3d8   :  { %v653_v61 = vrot.slane %v651_v55, 7  ;;  %v668_v62 = vrot.slane %v663_v56, 1  ;;  %v873_v10 = vmul.f32 %v644_v54, %v1371_v29  ;;  %v886_v15 = vmul.f32 %v644_v54, %v1378_v33 }
 0x3d9   :  { %v671_v63 = vrot.slane %v666_v1, 7  ;;  %v766_v29 = vmul.f32 %v1323_v52, %v1323_v52  ;;  %v775_v52 = vld [vmem:[%s1492_s5] sm:$0x7]  ;;  %s1176_s5 = smov [#allocation2]  }
 0x3da   :  { %v655_v14 = vsub.f32 %v648_v60, %v653_v61  ;;  %v673_v5 = vsel %vm437_vm7, %v664_v50, %v668_v62  ;;  %s922_s18 = sshll.u32 %s1176_s5, 4  ;;  %s923_s18 = int_to_ptr.vmem [resolvable:$true] %s922_s18 }
 0x3db   :  { %v1434_v6 = vsel %vm456_vm8, %v673_v5, %v671_v63  ;;  %v770_v22 = vsub.f32 1.0, %v766_v29  ;;  %s1148_s19 = scalar_lea.vmem %s923_s18, 128  ;;  %p1153_p1 = scmp.lt.s32.totalorder %s923_s18, %s923_s18 }
 0x3dc   :  { %v659_v8 = vadd.f32 %v657_v4, %v655_v14  ;;  %1056 = vmatprep.subr.msk.mxu1 %vm152_vm0, %v1434_v6  ;;  %p1149_p0 = scmp.ne.s32.totalorder %s923_s18, %s1148_s19  ;;  %p1154_p2 = scmp.lt.s32.totalorder %s1148_s19, %s1148_s19 }
 0x3dd   :  { %1057 = vmatpush3.msk.msra.mxu1 %vm152_vm0, %v1434_v6 }
 0x3de   :  { %1059 = vmatmul.mubr.msk.f32.vlgmr.msra.gmra.mrb[4].mxu1 %vm115_vm1, %v1235_v2  ;;  %v875_v0 = vrot.slane %v659_v8, 2  ;;  %v887_v9 = vrot.slane %v659_v8, 1  ;;  %v764_v2 = vmul.f32 %v1317_v45, %v1317_v45  ;;  %p1155_p3 = por %p1154_p2, %p1153_p1 }
 0x3df   :  { %1061 = vmatprep.mubr.msk.f32.mxu1 %vm115_vm1, %v1244_v3  ;;  %v763_v3 = vmul.f32 %v1319_v49, %v1319_v49 }
 0x3e0   :  { %v877_v12 = vmul.f32 %v875_v0, %v1378_v33  ;;  %v889_v13 = vmul.f32 %v887_v9, %v1380_v34  ;;  %v768_v19 = vsub.f32 1.0, %v764_v2  ;;  %v765_v33 = vmul.f32 %v1325_v53, %v1325_v53  ;;  %p1156_p4 = pnand %p1155_p3, %p1149_p0 }
 0x3e1   :  { %v767_v34 = vsub.f32 1.0, %v763_v3  ;;  %v384_v53 = vsub.f32 0.0, %v1359_v11 }
 0x3e2   :  { %1062 = vmatmul.mubr.msk.f32.gmra.mrb[6].mxu1 %vm115_vm1, %v1261_v7  ;;  %v878_v16 = vadd.f32 %v877_v12, %v873_v10  ;;  %v891_v17 = vrot.slane %v889_v13, 1  ;;  %v769_v27 = vsub.f32 1.0, %v765_v33 }
 0x3e3   :  { %v385_v32 = vmul.f32 1.442695, %v384_v53 }
 0x3e4   :  { %v893_v18 = vadd.f32 %v891_v17, %v886_v15 }
 0x3e5   :  { %1144 = vpow2.f32 %v385_v32 }
 0x3ef   :  { %v1145_v35 = vpop.eup %1144 }
 0x3f0   :  { %v387_v36 = vadd.f32 1.0, %v1145_v35 }
 0x3f2   :  { %1146 = vrcp.f32 %v387_v36 }
 0x3fc   :  { %v1147_v37 = vpop.eup %1146 }
 0x3fd   :  { %v853_v39 = vrot.slane %v1147_v37, 7 }
 0x3ff   :  { %v855_v42 = vmul.f32 %v853_v39, %v1359_v11 }
 0x4b1   :  { %v1060_v20 = vpop.f32.mrb[4].mxu1 }
 0x4b2   :  { %v772_v21 = vmul.f32 %v1060_v20, %v768_v19  ;;  %v744_v7 = vpop.f32.mrb[5].mxu1 }
 0x4b3   :  { %v771_v24 = vmul.f32 %v767_v34, %v744_v7 }
 0x4b5   :  { %v1094_v25 = vpack.c.bf16 %v772_v21, %v771_v24  ;;  %v1063_v26 = vpop.f32.mrb[6].mxu1 }
 0x4b6   :  { %v774_v45 = vmul.f32 %v1063_v26, %v770_v22  ;;  %v754_v30 = vpop.f32.mrb[7].mxu1 }
 0x4b7   :  { %v773_v31 = vmul.f32 %v769_v27, %v754_v30  ;;  %1095 = vmatpush3.bf16.msra.mxu0 %v1094_v25 }
 0x4b8   :  { %1096 = vmatprep.subr.bf16.mxu0 %v1173_v23  ;;  %v850_v23 = vmul.f32 %v1147_v37, %v849_v38 }
 0x4b9   :  { %v1097_v49 = vpack.c.bf16 %v774_v45, %v773_v31 }
 0x4bb   :  { %1098 = vmatpush3.bf16.msra.mxu0 %v1097_v49 }
 0x4be   :  { %1073 = vmatmul.mubr.msk.f32.vlgmr.msra.gmra.mrb[12].mxu0 %vm562_vm9, %v775_v52 }
 0x591   :  { %v845_v41 = vpop.f32.mrb[12].mxu0 }
 0x592   :  { %v851_v43 = vmul.f32 %v850_v23, %v845_v41  ;;  %v857_v44 = vrot.slane %v845_v41, 7  ;;  %v860_v46 = vrot.slane %v845_v41, 1  ;;  %v868_v47 = vmul.f32 %v867_v40, %v845_v41  ;;  %v1074_v48 = vpop.f32.mrb[13].mxu0 }
 0x594   :  { %v859_v50 = vmul.f32 %v857_v44, %v855_v42  ;;  %v862_v51 = vmul.f32 %v860_v46, %v1367_v28  ;;  %v870_v54 = vrot.slane %v851_v43, 1  ;;  %v879_v55 = vmul.f32 %v851_v43, %v432_v58 }
 0x596   :  { %v864_v56 = vrot.slane %v862_v51, 7  ;;  %v872_v1 = vadd.f32 %v870_v54, %v868_v47  ;;  %v880_v60 = vadd.f32 %v879_v55, %v878_v16 }
 0x598   :  { %v866_v61 = vadd.f32 %v864_v56, %v859_v50  ;;  %v899_v63 = vmul.f32 %v872_v1, %v1395_v59 }
 0x59a   :  { %v881_v62 = vmul.f32 %v866_v61, %v1395_v59  ;;  %v894_v11 = vmul.f32 %v866_v61, %v1392_v57  ;;  %v901_v0 = vrot.slane %v899_v63, 1 }
 0x59c   :  { %v883_v14 = vrot.slane %v881_v62, 1  ;;  %v896_v4 = vrot.slane %v894_v11, 1 }
 0x59e   :  { %v885_v5 = vadd.f32 %v883_v14, %v880_v60  ;;  %v898_v8 = vadd.f32 %v896_v4, %v893_v18 }
 0x5a0   :  { %v903_v28 = vadd.f32 %v901_v0, %v898_v8  ;;  %v905_v9 = vrot.slane %v885_v5, 5 }
 0x5a2   :  { %v908_v58 = vrot.slane %v903_v28, 4  ;;  %v910_v10 = vsel %vm152_vm0, %v1434_v6, %v905_v9 }
 0x5a4   :  { %v912_v12 = vsel %vm911_vm10, %v910_v10, %v908_v58 }
 0x5a5   :  { %v914_v57 = vsel %vm913_vm11, %v912_v12, 0.0 }
 0x5a6   :  { %915 = vst [vmem:[#allocation2] sm:$0x3f] %v914_v57 }
 0x5a7   :  { %1159 = shalt.err (!%p1156_p4)
}
 0x5a8   :  { %s1160_s22 = scalar_lea.hbm %s1495_s8, 128 }
 0x5a9   :  { %p1161_p5 = scmp.ne.s32.totalorder %s1495_s8, %s1160_s22  ;;  %p1164_p6 = scmp.lt.u32.totalorder %s1160_s22, %s1495_s8 }
 0x5ab   :  { %p1166_p7 = pnand %p1164_p6, %p1161_p5 }
 0x5ad   :  { %1169 = shalt.err (!%p1166_p7)
}
 0x5ae   :  { %925 = dma.vmem_to_hbm [thread:$0]  %s923_s18, 128, %s1495_s8, [#allocation3]  }
 0x5af   :  { %1170 = dma.done.wait [#allocation3], 128  }
 0x5b0   :  { %1171 = vsyncadd [#allocation3], 4294967168 }
 0x5b1   :  { %929 = vsyncpa [#allocation3], 1 }

</bundles_post_ra>
